<compile_context>
chip_gen: v6e
topology: v6e:2x2x1
jax: 0.10.0
libtpu: 0.0.40
codegen_flags: <defaults>
</compile_context>

<pallas_src>
import functools

import jax
import jax.numpy as jnp
from jax.experimental import pallas as pl
from jax.experimental.pallas import tpu as pltpu


def _round_up(n, m):
    return ((n + m - 1) // m) * m


# ----------------------------------------------------------------------------
# Kernel: fused 3-layer MLP (fc1 -> relu -> fc2 -> relu -> fc3), one batch
# tile per grid step.  Weights / biases use constant index_maps so they stay
# VMEM-resident across all batch tiles.  bf16 MXU inputs, f32 accumulation;
# bias add + ReLU stay in f32 on the VPU (v5e has no bf16 VPU).
# ----------------------------------------------------------------------------
def encoder_kernel(x_ref, w1_ref, b1_ref, w2_ref, b2_ref, w3_ref, b3_ref,
                   out_ref):
    # x arrives f32; cast to bf16 for the MXU inside the kernel.
    x = x_ref[...].astype(w1_ref.dtype)
    h1 = jnp.dot(x, w1_ref[...], preferred_element_type=jnp.float32)
    h1 = jnp.maximum(h1 + b1_ref[...], 0.0)
    h2 = jnp.dot(h1.astype(w2_ref.dtype), w2_ref[...],
                 preferred_element_type=jnp.float32)
    h2 = jnp.maximum(h2 + b2_ref[...], 0.0)
    out = jnp.dot(h2.astype(w3_ref.dtype), w3_ref[...],
                  preferred_element_type=jnp.float32)
    # Single lane-dense (TM, out_p) slab; (mean | log_var) split is a
    # zero-cost slice in the wrapper.
    out_ref[...] = (out + b3_ref[...]).astype(out_ref.dtype)


def pack_encoder_params(params):
    """One-time packing: zero-pad feature dims to 128 lanes and cast weights
    to bf16.  Call once at init / param update -- NOT per forward call."""
    w1, b1, w2, b2, w3, b3 = params
    input_dim, hidden_dim = w1.shape
    out_dim = w3.shape[1]
    in_p = _round_up(input_dim, 128)
    hid_p = _round_up(hidden_dim, 128)
    out_p = _round_up(out_dim, 128)
    bf16 = jnp.bfloat16
    # Zero padding is semantics-preserving: padded weight rows/cols are zero,
    # padded bias lanes are zero, and relu(0 + 0) == 0 contributes nothing.
    w1p = jnp.pad(w1, ((0, in_p - input_dim), (0, hid_p - hidden_dim))).astype(bf16)
    b1p = jnp.pad(b1, ((0, 0), (0, hid_p - hidden_dim)))                    # f32
    w2p = jnp.pad(w2, ((0, hid_p - hidden_dim),
                       (0, hid_p - hidden_dim))).astype(bf16)
    b2p = jnp.pad(b2, ((0, 0), (0, hid_p - hidden_dim)))                    # f32
    w3p = jnp.pad(w3, ((0, hid_p - hidden_dim),
                       (0, out_p - out_dim))).astype(bf16)
    b3p = jnp.pad(b3, ((0, 0), (0, out_p - out_dim)))                       # f32
    return (w1p, b1p, w2p, b2p, w3p, b3p)


def _encoder_pallas_call(x_p, packed, *, tm, ntiles, single_buffer_weights):
    w1p, b1p, w2p, b2p, w3p, b3p = packed
    in_p, hid_p = w1p.shape
    out_p = w3p.shape[1]
    b_p = ntiles * tm

    spec_kwargs = {}
    if single_buffer_weights:
        # Constant index_map -> fetched once; single-buffering halves the
        # weights' resident VMEM (matters for large hidden dims / v7x 64 MiB).
        spec_kwargs["pipeline_mode"] = pl.Buffered(1)

    def const(shape):
        return pl.BlockSpec(shape, lambda i: (0, 0), **spec_kwargs)

    flops = 2 * b_p * (in_p * hid_p + hid_p * hid_p + hid_p * out_p)
    bytes_accessed = (
        int(x_p.size) * x_p.dtype.itemsize
        + sum(int(a.size) * a.dtype.itemsize for a in packed)
        + b_p * out_p * 2)                                  # bf16 output

    return pl.pallas_call(
        encoder_kernel,
        out_shape=jax.ShapeDtypeStruct((b_p, out_p), jnp.bfloat16),
        grid=(ntiles,),
        in_specs=[
            pl.BlockSpec((tm, in_p), lambda i: (i, 0)),     # x: batch-tiled
            const((in_p, hid_p)),                           # w1 (resident)
            const((1, hid_p)),                              # b1
            const((hid_p, hid_p)),                          # w2
            const((1, hid_p)),                              # b2
            const((hid_p, out_p)),                          # w3
            const((1, out_p)),                              # b3
        ],
        out_specs=pl.BlockSpec((tm, out_p), lambda i: (i, 0)),
        compiler_params=pltpu.CompilerParams(
            dimension_semantics=("parallel",),
            # Scoped VMEM default (16/32/32 MiB on v5e/v6e/v7x) is the binding
            # limit, not physical VMEM; raise it explicitly with headroom.
            vmem_limit_bytes=64 * 1024 * 1024,
        ),
        cost_estimate=pl.CostEstimate(
            flops=flops, transcendentals=0, bytes_accessed=bytes_accessed),
    )(x_p, w1p, b1p, w2p, b2p, w3p, b3p)


@functools.partial(jax.jit, static_argnames=("z_dim",))
def encoder_forward(x, packed_params, *, z_dim):
    """Encoder forward on pre-packed params; returns (mean, log_var) in f32."""
    w1p = packed_params[0]
    in_p = w1p.shape[0]
    out_dim = 2 * z_dim
    B, input_dim = x.shape

    # Adaptive batch tiling: minimize padded rows (<8 wasted per tile), cap TM
    # at 512 for VMEM, and force >=2 grid steps when B > 256 so the "parallel"
    # grid axis can use both TensorCores on v7x.
    MAX_TM = 512
    ntiles = max(pl.cdiv(B, MAX_TM), 2 if B > 256 else 1)
    tm = _round_up(pl.cdiv(B, ntiles), 8)
    b_p = ntiles * tm

    x_p = x
    if b_p != B or in_p != input_dim:
        # Single f32 pad (batch rows + K lanes); no dtype cast here.
        x_p = jnp.pad(x, ((0, b_p - B), (0, in_p - input_dim)))

    try:
        out = _encoder_pallas_call(x_p, packed_params, tm=tm, ntiles=ntiles,
                                   single_buffer_weights=True)
    except Exception:
        # pipeline_mode=pl.Buffered(1) not supported -> default double buffering.
        out = _encoder_pallas_call(x_p, packed_params, tm=tm, ntiles=ntiles,
                                   single_buffer_weights=False)

    # Zero-cost slice of the combined (mean | log_var) slab; upcast to f32.
    mean = out[:B, :z_dim].astype(jnp.float32)
    log_var = out[:B, z_dim:out_dim].astype(jnp.float32)
    return mean, log_var


def init_encoder_params(key, input_dim, hidden_dim, z_dim):
    """PyTorch-Linear-style uniform fan-in init, stored as (in, out) so the
    kernel computes x @ W + b directly on the MXU."""
    ks = jax.random.split(key, 6)

    def linear(kw, kb, fan_in, fan_out):
        bound = 1.0 / jnp.sqrt(fan_in)
        w = jax.random.uniform(kw, (fan_in, fan_out), jnp.float32, -bound, bound)
        b = jax.random.uniform(kb, (1, fan_out), jnp.float32, -bound, bound)
        return w, b

    w1, b1 = linear(ks[0], ks[1], input_dim, hidden_dim)
    w2, b2 = linear(ks[2], ks[3], hidden_dim, hidden_dim)
    w3, b3 = linear(ks[4], ks[5], hidden_dim, z_dim * 2)
    return (w1, b1, w2, b2, w3, b3)


def encoder_reference(x, params, z_dim):
    """Plain-JAX f32 reference (mirrors the PyTorch forward)."""
    w1, b1, w2, b2, w3, b3 = params
    h1 = jnp.maximum(x @ w1 + b1, 0.0)
    h2 = jnp.maximum(h1 @ w2 + b2, 0.0)
    out = h2 @ w3 + b3
    return out[:, :z_dim], out[:, z_dim:]


if __name__ == "__main__":
    input_dim, hidden_dim, z_dim = 32, 64, 8
    batch = 8

    key = jax.random.PRNGKey(0)
    kx, kp = jax.random.split(key)
    x = jax.random.normal(kx, (batch, input_dim), jnp.float32)
    params = init_encoder_params(kp, input_dim, hidden_dim, z_dim)

    # One-time packing (pad + bf16 cast) -- not repeated per forward call.
    packed = pack_encoder_params(params)

    mean, log_var = encoder_forward(x, packed, z_dim=z_dim)
    jax.block_until_ready((mean, log_var))

    mean_ref, log_var_ref = encoder_reference(x, params, z_dim)
    assert mean.shape == (batch, z_dim) and log_var.shape == (batch, z_dim)
    # bf16 MXU inputs / bf16 output store (f32 accumulation) -> looser
    # tolerance vs the pure-f32 reference.
    assert jnp.allclose(mean, mean_ref, atol=3e-2, rtol=3e-2)
    assert jnp.allclose(log_var, log_var_ref, atol=3e-2, rtol=3e-2)

    print("KERNEL_OK")
</pallas_src>

<mosaic_0001>
module attributes {stable_mosaic.version = 11 : i64} {
  func.func @encoder_kernel(%arg0: i32, %arg1: memref<8x128xf32, #tpu.memory_space<vmem>>, %arg2: memref<128x128xbf16, #tpu.memory_space<vmem>>, %arg3: memref<1x128xf32, #tpu.memory_space<vmem>>, %arg4: memref<128x128xbf16, #tpu.memory_space<vmem>>, %arg5: memref<1x128xf32, #tpu.memory_space<vmem>>, %arg6: memref<128x128xbf16, #tpu.memory_space<vmem>>, %arg7: memref<1x128xf32, #tpu.memory_space<vmem>>, %arg8: memref<8x128xbf16, #tpu.memory_space<vmem>>) attributes {dimension_semantics = [#tpu.dimension_semantics<parallel>], iteration_bounds = array<i64: 1>, scalar_prefetch = 0 : i64, scratch_operands = 0 : i64, tpu.core_type = #tpu.core_type<tc>, window_params = [{transform_indices = @transform_0, window_bounds = array<i64: 8, 128>}, {pipeline_mode = #tpu.pipeline_mode<synchronous>, transform_indices = @transform_1, window_bounds = array<i64: 128, 128>}, {pipeline_mode = #tpu.pipeline_mode<synchronous>, transform_indices = @transform_2, window_bounds = array<i64: 1, 128>}, {pipeline_mode = #tpu.pipeline_mode<synchronous>, transform_indices = @transform_3, window_bounds = array<i64: 128, 128>}, {pipeline_mode = #tpu.pipeline_mode<synchronous>, transform_indices = @transform_4, window_bounds = array<i64: 1, 128>}, {pipeline_mode = #tpu.pipeline_mode<synchronous>, transform_indices = @transform_5, window_bounds = array<i64: 128, 128>}, {pipeline_mode = #tpu.pipeline_mode<synchronous>, transform_indices = @transform_6, window_bounds = array<i64: 1, 128>}, {transform_indices = @transform_7, window_bounds = array<i64: 8, 128>}]} {
    %c0 = arith.constant 0 : index
    %c0_0 = arith.constant 0 : index
    %0 = vector.load %arg1[%c0, %c0_0] : memref<8x128xf32, #tpu.memory_space<vmem>>, vector<8x128xf32>
    %1 = arith.truncf %0 : vector<8x128xf32> to vector<8x128xbf16>
    %c0_1 = arith.constant 0 : index
    %c0_2 = arith.constant 0 : index
    %2 = vector.load %arg2[%c0_1, %c0_2] : memref<128x128xbf16, #tpu.memory_space<vmem>>, vector<128x128xbf16>
    %cst = arith.constant dense<0.000000e+00> : vector<8x128xf32>
    %3 = tpu.matmul %1, %2, %cst {dimension_numbers = #tpu.dot_dimension_numbers<[1], [0], [0], [1], [0, 0, 1, 1], [], []>} : vector<8x128xbf16>, vector<128x128xbf16>, vector<8x128xf32> -> vector<8x128xf32>
    %c0_3 = arith.constant 0 : index
    %c0_4 = arith.constant 0 : index
    %4 = vector.load %arg3[%c0_3, %c0_4] : memref<1x128xf32, #tpu.memory_space<vmem>>, vector<1x128xf32>
    %5 = vector.broadcast %4 : vector<1x128xf32> to vector<8x128xf32>
    %6 = arith.addf %3, %5 : vector<8x128xf32>
    %cst_5 = arith.constant 0.000000e+00 : f32
    %7 = vector.broadcast %cst_5 : f32 to vector<8x128xf32>
    %8 = arith.maximumf %6, %7 : vector<8x128xf32>
    %9 = arith.truncf %8 : vector<8x128xf32> to vector<8x128xbf16>
    %c0_6 = arith.constant 0 : index
    %c0_7 = arith.constant 0 : index
    %10 = vector.load %arg4[%c0_6, %c0_7] : memref<128x128xbf16, #tpu.memory_space<vmem>>, vector<128x128xbf16>
    %cst_8 = arith.constant dense<0.000000e+00> : vector<8x128xf32>
    %11 = tpu.matmul %9, %10, %cst_8 {dimension_numbers = #tpu.dot_dimension_numbers<[1], [0], [0], [1], [0, 0, 1, 1], [], []>} : vector<8x128xbf16>, vector<128x128xbf16>, vector<8x128xf32> -> vector<8x128xf32>
    %c0_9 = arith.constant 0 : index
    %c0_10 = arith.constant 0 : index
    %12 = vector.load %arg5[%c0_9, %c0_10] : memref<1x128xf32, #tpu.memory_space<vmem>>, vector<1x128xf32>
    %13 = vector.broadcast %12 : vector<1x128xf32> to vector<8x128xf32>
    %14 = arith.addf %11, %13 : vector<8x128xf32>
    %cst_11 = arith.constant 0.000000e+00 : f32
    %15 = vector.broadcast %cst_11 : f32 to vector<8x128xf32>
    %16 = arith.maximumf %14, %15 : vector<8x128xf32>
    %17 = arith.truncf %16 : vector<8x128xf32> to vector<8x128xbf16>
    %c0_12 = arith.constant 0 : index
    %c0_13 = arith.constant 0 : index
    %18 = vector.load %arg6[%c0_12, %c0_13] : memref<128x128xbf16, #tpu.memory_space<vmem>>, vector<128x128xbf16>
    %cst_14 = arith.constant dense<0.000000e+00> : vector<8x128xf32>
    %19 = tpu.matmul %17, %18, %cst_14 {dimension_numbers = #tpu.dot_dimension_numbers<[1], [0], [0], [1], [0, 0, 1, 1], [], []>} : vector<8x128xbf16>, vector<128x128xbf16>, vector<8x128xf32> -> vector<8x128xf32>
    %c0_15 = arith.constant 0 : index
    %c0_16 = arith.constant 0 : index
    %20 = vector.load %arg7[%c0_15, %c0_16] : memref<1x128xf32, #tpu.memory_space<vmem>>, vector<1x128xf32>
    %21 = vector.broadcast %20 : vector<1x128xf32> to vector<8x128xf32>
    %22 = arith.addf %19, %21 : vector<8x128xf32>
    %23 = arith.truncf %22 : vector<8x128xf32> to vector<8x128xbf16>
    %c0_17 = arith.constant 0 : index
    %c0_18 = arith.constant 0 : index
    %24 = vector.load %arg8[%c0_17, %c0_18] : memref<8x128xbf16, #tpu.memory_space<vmem>>, vector<8x128xbf16>
    tpu.vector_store %arg8[%c0_17, %c0_18], %23 {strides = array<i32>} : memref<8x128xbf16, #tpu.memory_space<vmem>>, vector<8x128xbf16>,
    return
  }
  func.func @transform_0(%arg0: i32) -> (i32, i32) {
    %c0_i32 = arith.constant 0 : i32
    %c0_i32_0 = arith.constant 0 : i32
    return %arg0, %c0_i32 : i32, i32
  }
  func.func @transform_1(%arg0: i32) -> (i32, i32) {
    %c0_i32 = arith.constant 0 : i32
    %c0_i32_0 = arith.constant 0 : i32
    %c0_i32_1 = arith.constant 0 : i32
    return %c0_i32, %c0_i32_0 : i32, i32
  }
  func.func @transform_2(%arg0: i32) -> (i32, i32) {
    %c0_i32 = arith.constant 0 : i32
    %c0_i32_0 = arith.constant 0 : i32
    %c0_i32_1 = arith.constant 0 : i32
    return %c0_i32, %c0_i32_0 : i32, i32
  }
  func.func @transform_3(%arg0: i32) -> (i32, i32) {
    %c0_i32 = arith.constant 0 : i32
    %c0_i32_0 = arith.constant 0 : i32
    %c0_i32_1 = arith.constant 0 : i32
    return %c0_i32, %c0_i32_0 : i32, i32
  }
  func.func @transform_4(%arg0: i32) -> (i32, i32) {
    %c0_i32 = arith.constant 0 : i32
    %c0_i32_0 = arith.constant 0 : i32
    %c0_i32_1 = arith.constant 0 : i32
    return %c0_i32, %c0_i32_0 : i32, i32
  }
  func.func @transform_5(%arg0: i32) -> (i32, i32) {
    %c0_i32 = arith.constant 0 : i32
    %c0_i32_0 = arith.constant 0 : i32
    %c0_i32_1 = arith.constant 0 : i32
    return %c0_i32, %c0_i32_0 : i32, i32
  }
  func.func @transform_6(%arg0: i32) -> (i32, i32) {
    %c0_i32 = arith.constant 0 : i32
    %c0_i32_0 = arith.constant 0 : i32
    %c0_i32_1 = arith.constant 0 : i32
    return %c0_i32, %c0_i32_0 : i32, i32
  }
  func.func @transform_7(%arg0: i32) -> (i32, i32) {
    %c0_i32 = arith.constant 0 : i32
    %c0_i32_0 = arith.constant 0 : i32
    return %arg0, %c0_i32 : i32, i32
  }
}

</mosaic_0001>

<bundles_post_ra>
// kernel: encoder_forward.1
= control target key start
LH: loop header
LB: loop body
LE: loop exit
PB: predicated region body
PF: predicated region fallthrough
CT: control target
= control target key end

     0   :  { %12 = vsyncpa [#allocation3], 0  ;;  %s725_s0 = inlined_call_operand.vmem [shape: f32[8,128], index: 0, kind: input, shape index: {}]   ;;  %s726_s1 = inlined_call_operand.hbm [shape: bf16[128,128], index: 1, kind: input, shape index: {}]   ;;  %s727_s2 = inlined_call_operand.vmem [shape: f32[1,128], index: 2, kind: input, shape index: {}]   ;;  %s728_s3 = inlined_call_operand.hbm [shape: bf16[128,128], index: 3, kind: input, shape index: {}]   ;;  %s729_s4 = inlined_call_operand.vmem [shape: f32[1,128], index: 4, kind: input, shape index: {}]   ;;  %s730_s5 = inlined_call_operand.hbm [shape: bf16[128,128], index: 5, kind: input, shape index: {}]   ;;  %s731_s6 = inlined_call_operand.vmem [shape: f32[1,128], index: 6, kind: input, shape index: {}]   ;;  %s732_s7 = inlined_call_operand.vmem [shape: bf16[8,128], index: 7, kind: output, shape index: {}]  }
   0x1   :  { %13 = vsyncpa [#allocation5], 0  ;;  %s624_s24 = smov [#allocation4]   ;;  %s625_s26 = smov [#allocation2]  }
   0x2   :  { %s35_s25 = sshll.u32 %s624_s24, 4  ;;  %s21_s27 = sshll.u32 %s625_s26, 4  ;;  %s36_s25 = int_to_ptr.vmem [resolvable:$true] %s35_s25  ;;  %s22_s27 = int_to_ptr.vmem [resolvable:$true] %s21_s27 }
   0x3   :  { %s568_s28 = scalar_lea.vmem %s36_s25, 1024  ;;  %p573_p1 = scmp.lt.s32.totalorder %s36_s25, %s36_s25 }
   0x4   :  { %p569_p0 = scmp.ne.s32.totalorder %s36_s25, %s568_s28  ;;  %p574_p2 = scmp.lt.s32.totalorder %s568_s28, %s568_s28 }
   0x6   :  { %p575_p3 = por %p574_p2, %p573_p1 }
   0x8   :  { %p576_p4 = pnand %p575_p3, %p569_p0 }
   0xa   :  { %579 = shalt.err (!%p576_p4)
}
   0xb   :  { %s626_s29 = smov 64   ;;  %s627_s30 = smov 4  }
   0xc   :  { %41 = dma.hbm_to_vmem [thread:$0]  %s728_s3, 1024, %s36_s25, [#allocation5], %s626_s29, %s626_s29, %s627_s30  }
   0xd   :  { %s588_s10 = scalar_lea.vmem %s22_s27, 1024  ;;  %p593_p6 = scmp.lt.s32.totalorder %s22_s27, %s22_s27 }
   0xe   :  { %p589_p5 = scmp.ne.s32.totalorder %s22_s27, %s588_s10  ;;  %p594_p7 = scmp.lt.s32.totalorder %s588_s10, %s588_s10 }
  0x10   :  { %p595_p8 = por %p594_p7, %p593_p6 }
  0x12   :  { %p596_p9 = pnand %p595_p8, %p589_p5 }
  0x14   :  { %599 = shalt.err (!%p596_p9)
}
  0x15   :  { %27 = dma.hbm_to_vmem [thread:$0]  %s726_s1, 1024, %s22_s27, [#allocation3], %s626_s29, %s626_s29, %s627_s30  }
  0x16   :  { %s628_s13 = smov [#allocation6]  }
  0x17   :  { %s49_s14 = sshll.u32 %s628_s13, 4  ;;  %s50_s14 = int_to_ptr.vmem [resolvable:$true] %s49_s14 }
  0x18   :  { %s608_s15 = scalar_lea.vmem %s50_s14, 1024  ;;  %p613_p11 = scmp.lt.s32.totalorder %s50_s14, %s50_s14 }
  0x19   :  { %p609_p10 = scmp.ne.s32.totalorder %s50_s14, %s608_s15  ;;  %p614_p12 = scmp.lt.s32.totalorder %s608_s15, %s608_s15 }
  0x1b   :  { %p615_p13 = por %p614_p12, %p613_p11 }
  0x1d   :  { %p616_p0 = pnand %p615_p13, %p609_p10 }
  0x1f   :  { %619 = shalt.err (!%p616_p0)
}
  0x20   :  { %55 = dma.hbm_to_vmem [thread:$0]  %s730_s5, 1024, %s50_s14, [#allocation5], %s626_s29, %s626_s29, %s627_s30  }
  0x21   :  { %620 = dma.done.wait [#allocation3], 1024  }
  0x22   :  { %621 = vsyncadd [#allocation3], 4294966272 }
  0x23   :  { %622 = dma.done.wait [#allocation5], 2048  }
  0x24   :  { %623 = vsyncadd [#allocation5], 4294965248  ;;  %v629_v0 = vmov 0.0   ;;  %vm630_vm0 = vmmov 0   ;;  %v536_v1 = vld [vmem:[#allocation2 + $0x38] sm:$0xff]   ;;  %v537_v2 = vld [vmem:[#allocation2 + $0x30] sm:$0xff]  }
  0x25   :  { %469 = vmatprep.subr.bf16.mxu0 %v629_v0  ;;  %485 = vmatprep.mubr.msk.bf16.mxu0 %vm630_vm0, %v629_v0  ;;  %v538_v3 = vld [vmem:[#allocation2 + $0x28] sm:$0xff]   ;;  %v544_v4 = vld [vmem:[#allocation4 + $0x38] sm:$0xff]   ;;  %v539_v5 = vld [vmem:[#allocation2 + $0x20] sm:$0xff]  }
  0x26   :  { %489 = vmatprep.subr.bf16.mxu1 %v629_v0  ;;  %505 = vmatprep.mubr.msk.bf16.mxu1 %vm630_vm0, %v629_v0  ;;  %v545_v6 = vld [vmem:[#allocation4 + $0x30] sm:$0xff]   ;;  %v540_v7 = vld [vmem:[#allocation2 + $0x18] sm:$0xff]   ;;  %v546_v8 = vld [vmem:[#allocation4 + $0x28] sm:$0xff]  }
  0x27   :  { %470 = vmatpush3.bf16.msra.mxu0 %v536_v1  ;;  %490 = vmatpush3.bf16.msra.mxu1 %v544_v4  ;;  %v541_v9 = vld [vmem:[#allocation2 + $0x10] sm:$0xff]   ;;  %v547_v10 = vld [vmem:[#allocation4 + $0x20] sm:$0xff]   ;;  %v542_v11 = vld [vmem:[#allocation2 + $0x8] sm:$0xff]  }
  0x28   :  { %471 = vmatprep.subr.bf16.mxu0 %v629_v0  ;;  %491 = vmatprep.subr.bf16.mxu1 %v629_v0  ;;  %v548_v12 = vld [vmem:[#allocation4 + $0x18] sm:$0xff]   ;;  %v543_v13 = vld [vmem:[#allocation2] sm:$0xff]   ;;  %v549_v15 = vld [vmem:[#allocation4 + $0x10] sm:$0xff]  }
  0x29   :  { %v68_v14 = vld [vmem:[%s725_s0] sm:$0xff]  ;;  %v550_v17 = vld [vmem:[#allocation4 + $0x8] sm:$0xff]   ;;  %v552_v19 = vld [vmem:[#allocation6 + $0x38] sm:$0xff]  }
  0x2a   :  { %v69_v16 = vpack.c.bf16 %v68_v14, %v68_v14  ;;  %v551_v18 = vld [vmem:[#allocation4] sm:$0xff]   ;;  %v553_v20 = vld [vmem:[#allocation6 + $0x30] sm:$0xff]   ;;  %v554_v21 = vld [vmem:[#allocation6 + $0x28] sm:$0xff]  }
  0x2b   :  { %472 = vmatpush3.bf16.msra.mxu0 %v537_v2  ;;  %492 = vmatpush3.bf16.msra.mxu1 %v545_v6  ;;  %v555_v22 = vld [vmem:[#allocation6 + $0x20] sm:$0xff]   ;;  %v556_v23 = vld [vmem:[#allocation6 + $0x18] sm:$0xff]   ;;  %v557_v24 = vld [vmem:[#allocation6 + $0x10] sm:$0xff]  }
  0x2c   :  { %473 = vmatprep.subr.bf16.mxu0 %v629_v0  ;;  %493 = vmatprep.subr.bf16.mxu1 %v629_v0  ;;  %v415_v25 = vld [vmem:[%s727_s2] ss:$0 sm:$0xff]  ;;  %v558_v33 = vld [vmem:[#allocation6 + $0x8] sm:$0xff]  }
  0x2d   :  { %v559_v34 = vld [vmem:[#allocation6] sm:$0xff]  }
  0x2e   :  { %v424_v35 = vld [vmem:[%s729_s4] ss:$0 sm:$0xff] }
  0x2f   :  { %474 = vmatpush3.bf16.msra.mxu0 %v538_v3  ;;  %494 = vmatpush3.bf16.msra.mxu1 %v546_v8  ;;  %v433_v43 = vld [vmem:[%s731_s6] ss:$0 sm:$0xff] }
  0x30   :  { %475 = vmatprep.subr.bf16.mxu0 %v629_v0  ;;  %495 = vmatprep.subr.bf16.mxu1 %v629_v0 }
  0x33   :  { %476 = vmatpush3.bf16.msra.mxu0 %v539_v5  ;;  %496 = vmatpush3.bf16.msra.mxu1 %v547_v10 }
  0x34   :  { %477 = vmatprep.subr.bf16.mxu0 %v629_v0  ;;  %497 = vmatprep.subr.bf16.mxu1 %v629_v0 }
  0x37   :  { %478 = vmatpush3.bf16.msra.mxu0 %v540_v7  ;;  %498 = vmatpush3.bf16.msra.mxu1 %v548_v12 }
  0x38   :  { %479 = vmatprep.subr.bf16.mxu0 %v629_v0  ;;  %499 = vmatprep.subr.bf16.mxu1 %v629_v0 }
  0x3b   :  { %480 = vmatpush3.bf16.msra.mxu0 %v541_v9  ;;  %500 = vmatpush3.bf16.msra.mxu1 %v549_v15 }
  0x3c   :  { %481 = vmatprep.subr.bf16.mxu0 %v629_v0  ;;  %501 = vmatprep.subr.bf16.mxu1 %v629_v0 }
  0x3f   :  { %482 = vmatpush3.bf16.msra.mxu0 %v542_v11  ;;  %502 = vmatpush3.bf16.msra.mxu1 %v550_v17 }
  0x40   :  { %483 = vmatprep.subr.bf16.mxu0 %v629_v0  ;;  %503 = vmatprep.subr.bf16.mxu1 %v629_v0 }
  0x43   :  { %484 = vmatpush3.bf16.msra.mxu0 %v543_v13  ;;  %504 = vmatpush3.bf16.msra.mxu1 %v551_v18 }
  0x44   :  { %509 = vmatprep.subr.bf16.mxu0 %v629_v0 }
  0x46   :  { %486 = vmatmul.mubr.bf16.vlgmr.msra.gmra.mxu0 %v69_v16 }
  0x47   :  { %525 = vmatprep.mubr.msk.bf16.mxu0 %vm630_vm0, %v629_v0  ;;  %510 = vmatpush3.bf16.msra.mxu0 %v552_v19 }
  0x48   :  { %511 = vmatprep.subr.bf16.mxu0 %v629_v0 }
  0x4b   :  { %512 = vmatpush3.bf16.msra.mxu0 %v553_v20 }
  0x4c   :  { %513 = vmatprep.subr.bf16.mxu0 %v629_v0 }
  0x4f   :  { %514 = vmatpush3.bf16.msra.mxu0 %v554_v21 }
  0x50   :  { %515 = vmatprep.subr.bf16.mxu0 %v629_v0 }
  0x53   :  { %516 = vmatpush3.bf16.msra.mxu0 %v555_v22 }
  0x54   :  { %517 = vmatprep.subr.bf16.mxu0 %v629_v0 }
  0x57   :  { %518 = vmatpush3.bf16.msra.mxu0 %v556_v23 }
  0x58   :  { %519 = vmatprep.subr.bf16.mxu0 %v629_v0 }
  0x5b   :  { %520 = vmatpush3.bf16.msra.mxu0 %v557_v24 }
  0x5c   :  { %521 = vmatprep.subr.bf16.mxu0 %v629_v0 }
  0x5f   :  { %522 = vmatpush3.bf16.msra.mxu0 %v558_v33 }
  0x60   :  { %523 = vmatprep.subr.bf16.mxu0 %v629_v0 }
  0x63   :  { %524 = vmatpush3.bf16.msra.mxu0 %v559_v34 }
 0x106   :  { %v175_v26 = vpop.f32.mrf.mxu0 }
 0x107   :  { %v176_v27 = vadd.f32 %v415_v25, %v175_v26 }
 0x108   :  { %v487_v28 = vpop.f32.mrf.mxu0 }
 0x109   :  { %v181_v29 = vmax.f32 %v176_v27, 0.0 }
 0x10a   :  { %v178_v30 = vpop.f32.mrf.mxu0 }
 0x10b   :  { %v182_v31 = vpack.c.bf16 %v181_v29, %v181_v29 }
 0x10c   :  { %v488_v32 = vpop.f32.mrf.mxu0 }
 0x10d   :  { %506 = vmatmul.mubr.bf16.vlgmr.msra.gmra.mxu1 %v182_v31 }
 0x1cd   :  { %v288_v36 = vpop.f32.mrf.mxu1 }
 0x1ce   :  { %v289_v37 = vadd.f32 %v424_v35, %v288_v36 }
 0x1cf   :  { %v507_v38 = vpop.f32.mrf.mxu1 }
 0x1d0   :  { %v294_v39 = vmax.f32 %v289_v37, 0.0 }
 0x1d1   :  { %v291_v40 = vpop.f32.mrf.mxu1 }
 0x1d2   :  { %v295_v41 = vpack.c.bf16 %v294_v39, %v294_v39 }
 0x1d3   :  { %v508_v42 = vpop.f32.mrf.mxu1 }
 0x1d4   :  { %526 = vmatmul.mubr.bf16.vlgmr.msra.gmra.mxu0 %v295_v41 }
 0x294   :  { %v401_v44 = vpop.f32.mrf.mxu0 }
 0x295   :  { %v402_v45 = vadd.f32 %v433_v43, %v401_v44 }
 0x296   :  { %v527_v46 = vpop.f32.mrf.mxu0 }
 0x297   :  { %v407_v47 = vpack.c.bf16 %v402_v45, %v402_v45 }
 0x298   :  { %v404_v48 = vpop.f32.mrf.mxu0 }
 0x299   :  { %408 = vst [vmem:[%s732_s7] sm:$0xf] %v407_v47 }
 0x29a   :  { %v528_v49 = vpop.f32.mrf.mxu0 }
 0x29b   :  { %413 = vsyncpa [#allocation3], 1 }
 0x29c   :  { %414 = vsyncpa [#allocation5], 1 }

</bundles_post_ra>
